<compile_context>
chip_gen: v7x
topology: tpu7x:2x2x1
jax: 0.10.0
libtpu: 0.0.40
codegen_flags: <defaults>
</compile_context>

<pallas_src>
import functools

import jax
import jax.numpy as jnp
from jax.experimental import pallas as pl
from jax.experimental.pallas import tpu as pltpu


def _round_up(n, m):
    return (n + m - 1) // m * m


def _ffn_kernel(x_ref, w1_ref, b1_ref, w2_ref, b2_ref, *rest,
                keep_threshold: int, keep_scale: float):
    """One (tm, D) row tile: y = dropout(gelu(x @ w1 + b1) @ w2 + b2)."""
    if keep_threshold > 0:
        bits_ref, o_ref = rest
    else:
        (o_ref,) = rest

    # ---- Linear 1: bf16 operands on the MXU, f32 accumulation ----
    h = jnp.dot(x_ref[...], w1_ref[...], preferred_element_type=jnp.float32)
    h = h + b1_ref[...]

    # ---- Exact GELU (torch.nn.GELU default): 0.5*x*(1+erf(x/sqrt(2))), f32 ----
    h = 0.5 * h * (1.0 + jax.lax.erf(h * jnp.float32(0.7071067811865476)))

    # ---- Linear 2: cast hidden back to the MXU dtype, f32 accumulation ----
    y = jnp.dot(h.astype(w2_ref.dtype), w2_ref[...],
                preferred_element_type=jnp.float32)
    y = y + b2_ref[...]

    # ---- Dropout: drop iff bits < threshold, P(drop) = threshold / 2^32 = p ----
    if keep_threshold > 0:
        keep = bits_ref[...] >= jnp.uint32(keep_threshold)
        y = jnp.where(keep, y * jnp.float32(keep_scale), jnp.float32(0.0))

    o_ref[...] = y.astype(o_ref.dtype)


def _resident_spec(shape, index_map):
    """BlockSpec for a grid-invariant operand; single-buffered when supported."""
    if hasattr(pl, "Buffered"):
        try:
            return pl.BlockSpec(shape, index_map, pipeline_mode=pl.Buffered(1))
        except TypeError:
            pass
    return pl.BlockSpec(shape, index_map)


def fnet_feedforward(x, w1, b1, w2, b2, *, dropout_rate=0.1, rng_key=None,
                     tm=256, compute_dtype=jnp.bfloat16):
    """x: (B, S, D). w1: (D, F), b1: (F,), w2: (F, D), b2: (D,). -> (B, S, D)."""
    assert 0.0 <= dropout_rate < 1.0
    B, S, D = x.shape
    F = w1.shape[1]
    M = B * S

    # Big row tile by default; clamp for tiny inputs; pad M to a multiple of tm.
    tm = max(8, min(int(tm), _round_up(M, 8)))
    M_pad = _round_up(M, tm)

    x2 = x.reshape(M, D).astype(compute_dtype)
    if M_pad != M:
        x2 = jnp.pad(x2, ((0, M_pad - M), (0, 0)))
    w1c = w1.astype(compute_dtype)
    w2c = w2.astype(compute_dtype)
    b1_2 = b1.reshape(1, F).astype(jnp.float32)
    b2_2 = b2.reshape(1, D).astype(jnp.float32)

    use_dropout = dropout_rate > 0.0
    keep_threshold = min(int(round(dropout_rate * 2 ** 32)), 2 ** 32 - 1) if use_dropout else 0
    keep_scale = 1.0 / (1.0 - dropout_rate) if use_dropout else 1.0

    in_specs = [
        pl.BlockSpec((tm, D), lambda i: (i, 0)),      # x row tile (streamed)
        _resident_spec((D, F), lambda i: (0, 0)),     # w1 (full, resident)
        _resident_spec((1, F), lambda i: (0, 0)),     # b1
        _resident_spec((F, D), lambda i: (0, 0)),     # w2 (full, resident)
        _resident_spec((1, D), lambda i: (0, 0)),     # b2
    ]
    args = [x2, w1c, b1_2, w2c, b2_2]
    if use_dropout:
        if rng_key is None:
            rng_key = jax.random.PRNGKey(0)
        bits = jax.random.bits(rng_key, (M_pad, D), dtype=jnp.uint32)
        in_specs.append(pl.BlockSpec((tm, D), lambda i: (i, 0)))
        args.append(bits)

    # VMEM budget: resident weights/biases + double-buffered row tiles + f32 hidden.
    csize = jnp.dtype(compute_dtype).itemsize
    needed = ((D * F + F * D) * csize + (F + D) * 4
              + 2 * tm * D * (csize + 4)
              + (2 * tm * D * 4 if use_dropout else 0)
              + 2 * tm * F * 4)
    vmem_limit = int(min(max(2 * needed, 32 << 20), 64 << 20))

    cost = pl.CostEstimate(
        flops=4 * M_pad * D * F,            # two matmuls, 2 flops/MAC
        transcendentals=M_pad * F,          # erf
        bytes_accessed=(M_pad * D * (csize + 4)
                        + (D * F + F * D) * csize + (F + D) * 4
                        + (M_pad * D * 4 if use_dropout else 0)),
    )

    kernel = functools.partial(_ffn_kernel,
                               keep_threshold=keep_threshold,
                               keep_scale=float(keep_scale))

    # TODO(synk): for very large dim_ff (F >= ~3072 on v7x) add an F-blocked
    # reduction grid axis with a (tm, D) f32 accumulator to bound VMEM further.
    out2 = pl.pallas_call(
        kernel,
        out_shape=jax.ShapeDtypeStruct((M_pad, D), x.dtype),
        grid_spec=pltpu.PrefetchScalarGridSpec(
            num_scalar_prefetch=0,
            grid=(M_pad // tm,),
            in_specs=in_specs,
            out_specs=pl.BlockSpec((tm, D), lambda i: (i, 0)),
        ),
        compiler_params=pltpu.CompilerParams(
            dimension_semantics=("parallel",),
            vmem_limit_bytes=vmem_limit),
        cost_estimate=cost,
    )(*args)

    return out2[:M].reshape(B, S, D)


def init_params(key, d_model, dim_ff):
    """Deterministic init matching torch.nn.Linear's U(-1/sqrt(fan_in), 1/sqrt(fan_in))."""
    k1, k2, k3, k4 = jax.random.split(key, 4)
    lim1 = 1.0 / (d_model ** 0.5)
    lim2 = 1.0 / (dim_ff ** 0.5)
    w1 = jax.random.uniform(k1, (d_model, dim_ff), jnp.float32, -lim1, lim1)
    b1 = jax.random.uniform(k2, (dim_ff,), jnp.float32, -lim1, lim1)
    w2 = jax.random.uniform(k3, (dim_ff, d_model), jnp.float32, -lim2, lim2)
    b2 = jax.random.uniform(k4, (d_model,), jnp.float32, -lim2, lim2)
    return w1, b1, w2, b2


if __name__ == "__main__":
    # Small shapes consistent with the module: (batch, seq, d_model), dim_ff.
    B, S, D, FF = 2, 8, 128, 256
    dropout_rate = 0.1

    key = jax.random.PRNGKey(0)
    kx, kp, kd = jax.random.split(key, 3)
    x = jax.random.normal(kx, (B, S, D), dtype=jnp.float32)
    w1, b1, w2, b2 = init_params(kp, D, FF)

    out = fnet_feedforward(x, w1, b1, w2, b2,
                           dropout_rate=dropout_rate, rng_key=kd)
    jax.block_until_ready(out)

    # Sanity: dropout-disabled kernel vs a pure-JAX reference with identical bf16 casts.
    out_nodrop = fnet_feedforward(x, w1, b1, w2, b2, dropout_rate=0.0)
    jax.block_until_ready(out_nodrop)

    xb = x.reshape(-1, D).astype(jnp.bfloat16)
    h = jnp.dot(xb, w1.astype(jnp.bfloat16),
                preferred_element_type=jnp.float32) + b1
    h = 0.5 * h * (1.0 + jax.lax.erf(h * 0.7071067811865476))
    ref = (jnp.dot(h.astype(jnp.bfloat16), w2.astype(jnp.bfloat16),
                   preferred_element_type=jnp.float32) + b2).reshape(B, S, D)
    assert jnp.allclose(out_nodrop, ref, atol=2e-2, rtol=2e-2), \
        float(jnp.max(jnp.abs(out_nodrop - ref)))

    # Dropout statistics: fraction of exact zeros should be near dropout_rate.
    zero_frac = float(jnp.mean(out == 0.0))
    assert 0.02 < zero_frac < 0.25, zero_frac

    print("KERNEL_OK")
</pallas_src>

<mosaic_0001>
module attributes {stable_mosaic.version = 11 : i64} {
  func.func @_ffn_kernel(%arg0: i32, %arg1: memref<16x128xbf16, #tpu.memory_space<vmem>>, %arg2: memref<128x256xbf16, #tpu.memory_space<vmem>>, %arg3: memref<1x256xf32, #tpu.memory_space<vmem>>, %arg4: memref<256x128xbf16, #tpu.memory_space<vmem>>, %arg5: memref<1x128xf32, #tpu.memory_space<vmem>>, %arg6: memref<16x128xi32, #tpu.memory_space<vmem>>, %arg7: memref<16x128xf32, #tpu.memory_space<vmem>>) attributes {dimension_semantics = [#tpu.dimension_semantics<parallel>], iteration_bounds = array<i64: 1>, scalar_prefetch = 0 : i64, scratch_operands = 0 : i64, tpu.core_type = #tpu.core_type<tc>, window_params = [{transform_indices = @transform_0, window_bounds = array<i64: 16, 128>}, {pipeline_mode = #tpu.pipeline_mode<synchronous>, transform_indices = @transform_1, window_bounds = array<i64: 128, 256>}, {pipeline_mode = #tpu.pipeline_mode<synchronous>, transform_indices = @transform_2, window_bounds = array<i64: 1, 256>}, {pipeline_mode = #tpu.pipeline_mode<synchronous>, transform_indices = @transform_3, window_bounds = array<i64: 256, 128>}, {pipeline_mode = #tpu.pipeline_mode<synchronous>, transform_indices = @transform_4, window_bounds = array<i64: 1, 128>}, {transform_indices = @transform_5, window_bounds = array<i64: 16, 128>}, {transform_indices = @transform_6, window_bounds = array<i64: 16, 128>}]} {
    %c0 = arith.constant 0 : index
    %c0_0 = arith.constant 0 : index
    %0 = vector.load %arg1[%c0, %c0_0] : memref<16x128xbf16, #tpu.memory_space<vmem>>, vector<16x128xbf16>
    %c0_1 = arith.constant 0 : index
    %c0_2 = arith.constant 0 : index
    %1 = vector.load %arg2[%c0_1, %c0_2] : memref<128x256xbf16, #tpu.memory_space<vmem>>, vector<128x256xbf16>
    %cst = arith.constant dense<0.000000e+00> : vector<16x256xf32>
    %2 = tpu.matmul %0, %1, %cst {dimension_numbers = #tpu.dot_dimension_numbers<[1], [0], [0], [1], [0, 0, 1, 1], [], []>} : vector<16x128xbf16>, vector<128x256xbf16>, vector<16x256xf32> -> vector<16x256xf32>
    %c0_3 = arith.constant 0 : index
    %c0_4 = arith.constant 0 : index
    %3 = vector.load %arg3[%c0_3, %c0_4] : memref<1x256xf32, #tpu.memory_space<vmem>>, vector<1x256xf32>
    %4 = vector.broadcast %3 : vector<1x256xf32> to vector<16x256xf32>
    %5 = arith.addf %2, %4 : vector<16x256xf32>
    %cst_5 = arith.constant 5.000000e-01 : f32
    %6 = vector.broadcast %cst_5 : f32 to vector<16x256xf32>
    %7 = arith.mulf %6, %5 : vector<16x256xf32>
    %cst_6 = arith.constant 0.707106769 : f32
    %8 = vector.broadcast %cst_6 : f32 to vector<16x256xf32>
    %9 = arith.mulf %5, %8 : vector<16x256xf32>
    %10 = math.erf %9 : vector<16x256xf32>
    %cst_7 = arith.constant 1.000000e+00 : f32
    %11 = vector.broadcast %cst_7 : f32 to vector<16x256xf32>
    %12 = arith.addf %11, %10 : vector<16x256xf32>
    %13 = arith.mulf %7, %12 : vector<16x256xf32>
    %14 = arith.truncf %13 : vector<16x256xf32> to vector<16x256xbf16>
    %c0_8 = arith.constant 0 : index
    %c0_9 = arith.constant 0 : index
    %15 = vector.load %arg4[%c0_8, %c0_9] : memref<256x128xbf16, #tpu.memory_space<vmem>>, vector<256x128xbf16>
    %cst_10 = arith.constant dense<0.000000e+00> : vector<16x128xf32>
    %16 = tpu.matmul %14, %15, %cst_10 {dimension_numbers = #tpu.dot_dimension_numbers<[1], [0], [0], [1], [0, 0, 1, 1], [], []>} : vector<16x256xbf16>, vector<256x128xbf16>, vector<16x128xf32> -> vector<16x128xf32>
    %c0_11 = arith.constant 0 : index
    %c0_12 = arith.constant 0 : index
    %17 = vector.load %arg5[%c0_11, %c0_12] : memref<1x128xf32, #tpu.memory_space<vmem>>, vector<1x128xf32>
    %18 = vector.broadcast %17 : vector<1x128xf32> to vector<16x128xf32>
    %19 = arith.addf %16, %18 : vector<16x128xf32>
    %c0_13 = arith.constant 0 : index
    %c0_14 = arith.constant 0 : index
    %20 = vector.load %arg6[%c0_13, %c0_14] : memref<16x128xi32, #tpu.memory_space<vmem>>, vector<16x128xi32>
    %c429496730_i32 = arith.constant 429496730 : i32
    %21 = vector.broadcast %c429496730_i32 : i32 to vector<16x128xi32>
    %22 = arith.cmpi uge, %20, %21 : vector<16x128xi32>
    %cst_15 = arith.constant 1.11111116 : f32
    %23 = vector.broadcast %cst_15 : f32 to vector<16x128xf32>
    %24 = arith.mulf %19, %23 : vector<16x128xf32>
    %cst_16 = arith.constant 0.000000e+00 : f32
    %25 = vector.broadcast %cst_16 : f32 to vector<16x128xf32>
    %26 = arith.select %22, %24, %25 : vector<16x128xi1>, vector<16x128xf32>
    %c0_17 = arith.constant 0 : index
    %c0_18 = arith.constant 0 : index
    %27 = vector.load %arg7[%c0_17, %c0_18] : memref<16x128xf32, #tpu.memory_space<vmem>>, vector<16x128xf32>
    tpu.vector_store %arg7[%c0_17, %c0_18], %26 {strides = array<i32>} : memref<16x128xf32, #tpu.memory_space<vmem>>, vector<16x128xf32>,
    return
  }
  func.func @transform_0(%arg0: i32) -> (i32, i32) {
    %c0_i32 = arith.constant 0 : i32
    %c0_i32_0 = arith.constant 0 : i32
    return %arg0, %c0_i32 : i32, i32
  }
  func.func @transform_1(%arg0: i32) -> (i32, i32) {
    %c0_i32 = arith.constant 0 : i32
    %c0_i32_0 = arith.constant 0 : i32
    %c0_i32_1 = arith.constant 0 : i32
    return %c0_i32, %c0_i32_0 : i32, i32
  }
  func.func @transform_2(%arg0: i32) -> (i32, i32) {
    %c0_i32 = arith.constant 0 : i32
    %c0_i32_0 = arith.constant 0 : i32
    %c0_i32_1 = arith.constant 0 : i32
    return %c0_i32, %c0_i32_0 : i32, i32
  }
  func.func @transform_3(%arg0: i32) -> (i32, i32) {
    %c0_i32 = arith.constant 0 : i32
    %c0_i32_0 = arith.constant 0 : i32
    %c0_i32_1 = arith.constant 0 : i32
    return %c0_i32, %c0_i32_0 : i32, i32
  }
  func.func @transform_4(%arg0: i32) -> (i32, i32) {
    %c0_i32 = arith.constant 0 : i32
    %c0_i32_0 = arith.constant 0 : i32
    %c0_i32_1 = arith.constant 0 : i32
    return %c0_i32, %c0_i32_0 : i32, i32
  }
  func.func @transform_5(%arg0: i32) -> (i32, i32) {
    %c0_i32 = arith.constant 0 : i32
    %c0_i32_0 = arith.constant 0 : i32
    return %arg0, %c0_i32 : i32, i32
  }
  func.func @transform_6(%arg0: i32) -> (i32, i32) {
    %c0_i32 = arith.constant 0 : i32
    %c0_i32_0 = arith.constant 0 : i32
    return %arg0, %c0_i32 : i32, i32
  }
}

</mosaic_0001>

<bundles_post_ra>
// kernel: tpu_custom_call.1
= control target key start
LH: loop header
LB: loop body
LE: loop exit
PB: predicated region body
PF: predicated region fallthrough
CT: control target
= control target key end

     0   :  { %11 = vsyncpa [#allocation3], 0  ;;  %s817_s0 = inlined_call_operand.hbm [shape: bf16[16,128], index: 0, kind: input, shape index: {}]   ;;  %s818_s1 = inlined_call_operand.hbm [shape: bf16[128,256], index: 1, kind: input, shape index: {}]   ;;  %s819_s2 = inlined_call_operand.vmem [shape: f32[1,256], index: 2, kind: input, shape index: {}]   ;;  %s820_s3 = inlined_call_operand.hbm [shape: bf16[256,128], index: 3, kind: input, shape index: {}]   ;;  %s821_s4 = inlined_call_operand.hbm [shape: f32[1,128], index: 4, kind: input, shape index: {}]   ;;  %s822_s5 = inlined_call_operand.vmem [shape: u32[16,128], index: 5, kind: input, shape index: {}]   ;;  %s823_s6 = inlined_call_operand.hbm [shape: f32[16,128], index: 6, kind: output, shape index: {}]  }
   0x1   :  { %12 = vsyncpa [#allocation6], 0 }
   0x2   :  { %13 = vsyncpa [#allocation9], 0 }
   0x3   :  { %14 = vsyncpa [#allocation4], 0  ;;  %s697_s21 = smov [#allocation5]   ;;  %s579_s25 = scalar_lea.hbm %s818_s1, 2048 }
   0x4   :  { %s32_s22 = sshll.u32 %s697_s21, 4  ;;  %p580_p0 = scmp.ne.s32.totalorder %s818_s1, %s579_s25  ;;  %s33_s22 = int_to_ptr.vmem [resolvable:$true] %s32_s22 }
   0x5   :  { %p583_p1 = scmp.lt.u32.totalorder %s579_s25, %s818_s1 }
   0x7   :  { %p585_p2 = pnand %p583_p1, %p580_p0 }
   0x9   :  { %588 = shalt.err (!%p585_p2)
}
   0xa   :  { %s589_s30 = scalar_lea.vmem %s33_s22, 2048  ;;  %p594_p4 = scmp.lt.s32.totalorder %s33_s22, %s33_s22 }
   0xb   :  { %p590_p3 = scmp.ne.s32.totalorder %s33_s22, %s589_s30  ;;  %p595_p5 = scmp.lt.s32.totalorder %s589_s30, %s589_s30 }
   0xd   :  { %p596_p6 = por %p595_p5, %p594_p4 }
   0xf   :  { %p597_p7 = pnand %p596_p6, %p590_p3 }
  0x11   :  { %600 = shalt.err (!%p597_p7)
}
  0x12   :  { %s698_s7 = smov 128   ;;  %s699_s8 = smov 8  }
  0x13   :  { %38 = dma.hbm_to_vmem [thread:$0]  %s818_s1, 2048, %s33_s22, [#allocation6], %s698_s7, %s698_s7, %s699_s8  }
  0x14   :  { %s700_s11 = smov [#allocation2]   ;;  %s601_s15 = scalar_lea.hbm %s817_s0, 128 }
  0x15   :  { %s20_s12 = sshll.u32 %s700_s11, 4  ;;  %p602_p8 = scmp.ne.s32.totalorder %s817_s0, %s601_s15  ;;  %s21_s12 = int_to_ptr.vmem [resolvable:$true] %s20_s12 }
  0x16   :  { %p605_p9 = scmp.lt.u32.totalorder %s601_s15, %s817_s0 }
  0x18   :  { %p607_p10 = pnand %p605_p9, %p602_p8 }
  0x1a   :  { %610 = shalt.err (!%p607_p10)
}
  0x1b   :  { %s611_s20 = scalar_lea.vmem %s21_s12, 128  ;;  %p616_p12 = scmp.lt.s32.totalorder %s21_s12, %s21_s12 }
  0x1c   :  { %p612_p11 = scmp.ne.s32.totalorder %s21_s12, %s611_s20  ;;  %p617_p13 = scmp.lt.s32.totalorder %s611_s20, %s611_s20 }
  0x1e   :  { %p618_p0 = por %p617_p13, %p616_p12 }
  0x20   :  { %p619_p1 = pnand %p618_p0, %p612_p11 }
  0x22   :  { %622 = shalt.err (!%p619_p1)
}
  0x23   :  { %s701_s1 = smov 64   ;;  %s702_s21 = smov 4  }
  0x24   :  { %26 = dma.hbm_to_vmem [thread:$0]  %s817_s0, 128, %s21_s12, [#allocation3], %s701_s1, %s701_s1, %s702_s21  }
  0x25   :  { %s703_s24 = smov [#allocation7]   ;;  %s704_s26 = smov [#allocation8]  }
  0x26   :  { %s46_s25 = sshll.u32 %s703_s24, 4  ;;  %s59_s27 = sshll.u32 %s704_s26, 4  ;;  %s47_s25 = int_to_ptr.vmem [resolvable:$true] %s46_s25  ;;  %s60_s27 = int_to_ptr.vmem [resolvable:$true] %s59_s27 }
  0x27   :  { %s623_s30 = scalar_lea.hbm %s820_s3, 2048 }
  0x28   :  { %p624_p2 = scmp.ne.s32.totalorder %s820_s3, %s623_s30  ;;  %p627_p3 = scmp.lt.u32.totalorder %s623_s30, %s820_s3 }
  0x2a   :  { %p629_p4 = pnand %p627_p3, %p624_p2 }
  0x2c   :  { %632 = shalt.err (!%p629_p4)
}
  0x2d   :  { %s633_s0 = scalar_lea.vmem %s47_s25, 2048  ;;  %p638_p6 = scmp.lt.s32.totalorder %s47_s25, %s47_s25 }
  0x2e   :  { %p634_p5 = scmp.ne.s32.totalorder %s47_s25, %s633_s0  ;;  %p639_p7 = scmp.lt.s32.totalorder %s633_s0, %s633_s0 }
  0x30   :  { %p640_p8 = por %p639_p7, %p638_p6 }
  0x32   :  { %p641_p9 = pnand %p640_p8, %p634_p5 }
  0x34   :  { %644 = shalt.err (!%p641_p9)
}
  0x35   :  { %52 = dma.hbm_to_vmem [thread:$0]  %s820_s3, 2048, %s47_s25, [#allocation6], %s701_s1, %s701_s1, %s702_s21  }
  0x36   :  { %s645_s17 = scalar_lea.hbm %s821_s4, 16 }
  0x37   :  { %p646_p10 = scmp.ne.s32.totalorder %s821_s4, %s645_s17  ;;  %p649_p11 = scmp.lt.u32.totalorder %s645_s17, %s821_s4 }
  0x39   :  { %p651_p12 = pnand %p649_p11, %p646_p10 }
  0x3b   :  { %654 = shalt.err (!%p651_p12)
}
  0x3c   :  { %s655_s23 = scalar_lea.vmem %s60_s27, 16  ;;  %s659_s24 = scalar_lea.vmem %s60_s27, 32 }
  0x3d   :  { %p656_p13 = scmp.ne.s32.totalorder %s60_s27, %s655_s23  ;;  %p660_p0 = scmp.lt.s32.totalorder %s60_s27, %s60_s27 }
  0x3e   :  { %p661_p1 = scmp.lt.s32.totalorder %s659_s24, %s655_s23 }
  0x40   :  { %p662_p2 = por %p661_p1, %p660_p0 }
  0x42   :  { %p663_p3 = pnand %p662_p2, %p656_p13 }
  0x44   :  { %666 = shalt.err (!%p663_p3)
}
  0x45   :  { %62 = dma.hbm_to_vmem [thread:$0]  %s821_s4, 16, %s60_s27, [#allocation9]  }
  0x46   :  { %689 = dma.done.wait [#allocation3], 128  }
  0x47   :  { %690 = vsyncadd [#allocation3], 4294967168 }
  0x48   :  { %691 = dma.done.wait [#allocation6], 4096  }
  0x49   :  { %692 = vsyncadd [#allocation6], 4294963200 }
  0x4a   :  { %693 = dma.done.wait [#allocation9], 16  }
  0x4b   :  { %694 = vsyncadd [#allocation9], 4294967280  ;;  %v705_v0 = vmov 0   ;;  %v530_v1 = vld [vmem:[#allocation5 + $0x4] ss:$8 sps:$4 sm:$0xff]   ;;  %v554_v21 = vld [vmem:[#allocation2] sm:$0xff]   ;;  %v98_v34 = vlaneseq }
  0x4c   :  { %226 = vmatprep.mubr.bf16.mxu0 %v705_v0  ;;  %v532_v2 = vld [vmem:[#allocation5] ss:$8 sps:$4 sm:$0xff]   ;;  %194 = vmatprep.subr.bf16.mxu0 %v530_v1  ;;  %v533_v3 = vld [vmem:[#allocation5 + $0x14] ss:$8 sps:$4 sm:$0xff]   ;;  %v535_v4 = vld [vmem:[#allocation5 + $0x10] ss:$8 sps:$4 sm:$0xff]  }
  0x4d   :  { %195 = vmatpush1.bf16.msra.mxu0 %v532_v2  ;;  %v536_v5 = vld [vmem:[#allocation5 + $0x24] ss:$8 sps:$4 sm:$0xff]   ;;  %v538_v6 = vld [vmem:[#allocation5 + $0x20] ss:$8 sps:$4 sm:$0xff]   ;;  %v539_v7 = vld [vmem:[#allocation5 + $0x34] ss:$8 sps:$4 sm:$0xff]  }
  0x4e   :  { %196 = vmatprep.subr.bf16.mxu0 %v533_v3  ;;  %v541_v8 = vld [vmem:[#allocation5 + $0x30] ss:$8 sps:$4 sm:$0xff]   ;;  %v542_v9 = vld [vmem:[#allocation5 + $0x44] ss:$8 sps:$4 sm:$0xff]   ;;  %v544_v11 = vld [vmem:[#allocation5 + $0x40] ss:$8 sps:$4 sm:$0xff]  }
  0x4f   :  { %v555_v10 = vld [vmem:[#allocation7 + $0x40] sm:$0xff]   ;;  %v557_v13 = vld [vmem:[#allocation7 + $0x48] sm:$0xff]   ;;  %v545_v14 = vld [vmem:[#allocation5 + $0x54] ss:$8 sps:$4 sm:$0xff]   ;;  %v99_v35 = vshrl.u32 %v98_v34, 7  ;;  %s706_s28 = smov [#allocation10]  }
  0x50   :  { %v556_v12 = vld [vmem:[#allocation7] sm:$0xff]   ;;  %498 = vmatprep.subr.bf16.mxu1 %v555_v10  ;;  %v558_v15 = vld [vmem:[#allocation7 + $0x8] sm:$0xff]   ;;  %v547_v16 = vld [vmem:[#allocation5 + $0x50] ss:$8 sps:$4 sm:$0xff]   ;;  %s450_s29 = sshll.u32 %s706_s28, 4  ;;  %s451_s29 = int_to_ptr.vmem [resolvable:$true] %s450_s29 }
  0x51   :  { %197 = vmatpush1.bf16.msra.mxu0 %v535_v4  ;;  %499 = vmatpush3.bf16.msra.mxu1 %v556_v12  ;;  %v548_v17 = vld [vmem:[#allocation5 + $0x64] ss:$8 sps:$4 sm:$0xff]   ;;  %v550_v18 = vld [vmem:[#allocation5 + $0x60] ss:$8 sps:$4 sm:$0xff]   ;;  %v551_v19 = vld [vmem:[#allocation5 + $0x74] ss:$8 sps:$4 sm:$0xff]   ;;  %p672_p5 = scmp.lt.s32.totalorder %s451_s29, %s451_s29 }
  0x52   :  { %198 = vmatprep.subr.bf16.mxu0 %v536_v5  ;;  %500 = vmatprep.subr.bf16.mxu1 %v557_v13  ;;  %v553_v20 = vld [vmem:[#allocation5 + $0x70] ss:$8 sps:$4 sm:$0xff]   ;;  %v563_v26 = vld [vmem:[#allocation7 + $0x60] sm:$0xff]   ;;  %v565_v28 = vld [vmem:[#allocation7 + $0x68] sm:$0xff]   ;;  %v100_v36 = vsub.s32 0, %v99_v35  ;;  %v104_v38 = vsub.s32 1, %v99_v35 }
  0x53   :  { %v559_v22 = vld [vmem:[#allocation7 + $0x50] sm:$0xff]   ;;  %v561_v24 = vld [vmem:[#allocation7 + $0x58] sm:$0xff]   ;;  %v564_v27 = vld [vmem:[#allocation7 + $0x20] sm:$0xff]   ;;  %s667_s30 = scalar_lea.vmem %s451_s29, 256 }
  0x54   :  { %v560_v23 = vld [vmem:[#allocation7 + $0x10] sm:$0xff]   ;;  %v562_v25 = vld [vmem:[#allocation7 + $0x18] sm:$0xff]   ;;  %v566_v29 = vld [vmem:[#allocation7 + $0x28] sm:$0xff]   ;;  %p668_p4 = scmp.ne.s32.totalorder %s451_s29, %s667_s30  ;;  %p673_p6 = scmp.lt.s32.totalorder %s667_s30, %s667_s30 }
  0x55   :  { %199 = vmatpush1.bf16.msra.mxu0 %v538_v6  ;;  %501 = vmatpush3.bf16.msra.mxu1 %v558_v15  ;;  %v567_v30 = vld [vmem:[#allocation7 + $0x70] sm:$0xff]   ;;  %v569_v32 = vld [vmem:[#allocation7 + $0x78] sm:$0xff]   ;;  %v96_v37 = vld [vmem:[%s819_s2] sm:$0x3] }
  0x56   :  { %200 = vmatprep.subr.bf16.mxu0 %v539_v7  ;;  %502 = vmatprep.subr.bf16.mxu1 %v559_v22  ;;  %v568_v31 = vld [vmem:[#allocation7 + $0x30] sm:$0xff]   ;;  %v570_v33 = vld [vmem:[#allocation7 + $0x38] sm:$0xff]   ;;  %v101_v39 = vrot.slane %v96_v37, %v100_v36  ;;  %v105_v40 = vrot.slane %v96_v37, %v104_v38  ;;  %v435_v12 = vld [vmem:[%s822_s5] sm:$0xff]  ;;  %p674_p7 = por %p673_p6, %p672_p5 }
  0x57   :  { %vm437_vm0 = vcmp.ge.u32.totalorder %v435_v12, 429496730 }
  0x58   :  { %p675_p8 = pnand %p674_p7, %p668_p4 }
  0x59   :  { %201 = vmatpush1.bf16.msra.mxu0 %v541_v8  ;;  %503 = vmatpush3.bf16.msra.mxu1 %v560_v23  ;;  %v481_v8 = vld [vmem:[#allocation8] ss:$0 sm:$0xff] }
  0x5a   :  { %202 = vmatprep.subr.bf16.mxu0 %v542_v9  ;;  %504 = vmatprep.subr.bf16.mxu1 %v561_v24 }
  0x5d   :  { %203 = vmatpush1.bf16.msra.mxu0 %v544_v11  ;;  %505 = vmatpush3.bf16.msra.mxu1 %v562_v25 }
  0x5e   :  { %204 = vmatprep.subr.bf16.mxu0 %v545_v14  ;;  %506 = vmatprep.subr.bf16.mxu1 %v563_v26 }
  0x61   :  { %205 = vmatpush1.bf16.msra.mxu0 %v547_v16  ;;  %507 = vmatpush3.bf16.msra.mxu1 %v564_v27  ;;  %v436_v16 = vld [vmem:[%s822_s5 + $0x8] sm:$0xff] }
  0x62   :  { %206 = vmatprep.subr.bf16.mxu0 %v548_v17  ;;  %508 = vmatprep.subr.bf16.mxu1 %v565_v28  ;;  %vm438_vm1 = vcmp.ge.u32.totalorder %v436_v16, 429496730 }
  0x65   :  { %207 = vmatpush1.bf16.msra.mxu0 %v550_v18  ;;  %509 = vmatpush3.bf16.msra.mxu1 %v566_v29 }
  0x66   :  { %208 = vmatprep.subr.bf16.mxu0 %v551_v19  ;;  %510 = vmatprep.subr.bf16.mxu1 %v567_v30 }
  0x69   :  { %209 = vmatpush1.bf16.msra.mxu0 %v553_v20  ;;  %511 = vmatpush3.bf16.msra.mxu1 %v568_v31 }
  0x6a   :  { %512 = vmatprep.subr.bf16.mxu1 %v569_v32 }
  0x6c   :  { %227 = vmatmul.mubr.bf16.vlgmr.msra.gmra.mrb[0].mxu0 %v554_v21 }
  0x6d   :  { %513 = vmatpush3.bf16.msra.mxu1 %v570_v33 }
 0x13f   :  { %v228_v41 = vpop.f32.mrb[0].mxu0 }
 0x140   :  { %v229_v42 = vadd.f32 %v228_v41, %v101_v39  ;;  %v230_v43 = vpop.f32.mrb[1].mxu0 }
 0x141   :  { %v231_v44 = vadd.f32 %v230_v43, %v105_v40  ;;  %v232_v45 = vpop.f32.mrb[2].mxu0 }
 0x142   :  { %v241_v46 = vmul.f32 0.70710677, %v229_v42  ;;  %v233_v47 = vadd.f32 %v232_v45, %v101_v39  ;;  %v234_v48 = vpop.f32.mrb[3].mxu0  ;;  %v237_v59 = vmul.f32 0.5, %v229_v42 }
 0x143   :  { %v242_v49 = vmul.f32 0.70710677, %v231_v44  ;;  %v235_v50 = vadd.f32 %v234_v48, %v105_v40  ;;  %v238_v62 = vmul.f32 0.5, %v231_v44 }
 0x144   :  { %571 = verf.f32 %v241_v46  ;;  %v243_v51 = vmul.f32 0.70710677, %v233_v47  ;;  %v239_v60 = vmul.f32 0.5, %v233_v47 }
 0x145   :  { %573 = verf.f32 %v242_v49  ;;  %v244_v52 = vmul.f32 0.70710677, %v235_v50  ;;  %v240_v63 = vmul.f32 0.5, %v235_v50 }
 0x146   :  { %575 = verf.f32 %v243_v51 }
 0x147   :  { %577 = verf.f32 %v244_v52 }
 0x14e   :  { %v572_v53 = vpop.eup %571 }
 0x14f   :  { %v574_v54 = vpop.eup %573  ;;  %v249_v55 = vadd.f32 1.0, %v572_v53 }
 0x150   :  { %v576_v56 = vpop.eup %575  ;;  %v250_v57 = vadd.f32 1.0, %v574_v54 }
 0x151   :  { %v578_v58 = vpop.eup %577  ;;  %v251_v61 = vadd.f32 1.0, %v576_v56  ;;  %v253_v1 = vmul.f32 %v249_v55, %v237_v59 }
 0x152   :  { %v252_v0 = vadd.f32 1.0, %v578_v58  ;;  %v254_v3 = vmul.f32 %v250_v57, %v238_v62 }
 0x153   :  { %v255_v2 = vmul.f32 %v251_v61, %v239_v60 }
 0x154   :  { %v256_v4 = vmul.f32 %v252_v0, %v240_v63 }
 0x155   :  { %v257_v5 = vpack.c.bf16 %v255_v2, %v253_v1 }
 0x156   :  { %v258_v6 = vpack.c.bf16 %v256_v4, %v254_v3 }
 0x158   :  { %426 = vmatprep.mubr.bf16.mxu1 %v258_v6 }
 0x159   :  { %427 = vmatmul.mubr.bf16.vlgmr.msra.gmra.mrb[0].mxu1 %v257_v5 }
 0x22c   :  { %v514_v7 = vpop.f32.mrb[0].mxu1 }
 0x22d   :  { %v515_v9 = vpop.f32.mrb[1].mxu1 }
 0x22e   :  { %v516_v10 = vadd.f32 %v515_v9, %v514_v7  ;;  %v517_v11 = vpop.f32.mrb[2].mxu1 }
 0x22f   :  { %v518_v13 = vpop.f32.mrb[3].mxu1 }
 0x230   :  { %v429_v14 = vadd.f32 %v516_v10, %v481_v8  ;;  %v519_v15 = vadd.f32 %v518_v13, %v517_v11 }
 0x232   :  { %v439_v17 = vmul.f32 1.1111112, %v429_v14  ;;  %v432_v18 = vadd.f32 %v519_v15, %v481_v8 }
 0x234   :  { %v440_v19 = vmul.f32 1.1111112, %v432_v18  ;;  %v441_v20 = vsel %vm437_vm0, %v439_v17, 0.0 }
 0x235   :  { %443 = vst [vmem:[#allocation10] sm:$0xff] %v441_v20 }
 0x236   :  { %v442_v21 = vsel %vm438_vm1, %v440_v19, 0.0 }
 0x237   :  { %444 = vst [vmem:[#allocation10 + $0x8] sm:$0xff] %v442_v21 }
 0x238   :  { %678 = shalt.err (!%p675_p8)
}
 0x239   :  { %s679_s10 = scalar_lea.hbm %s823_s6, 256 }
 0x23a   :  { %p680_p9 = scmp.ne.s32.totalorder %s823_s6, %s679_s10  ;;  %p683_p10 = scmp.lt.u32.totalorder %s679_s10, %s823_s6 }
 0x23c   :  { %p685_p11 = pnand %p683_p10, %p680_p9 }
 0x23e   :  { %688 = shalt.err (!%p685_p11)
}
 0x23f   :  { %456 = dma.vmem_to_hbm [thread:$0]  %s451_s29, 256, %s823_s6, [#allocation4], %s698_s7, %s698_s7, %s699_s8  }
 0x240   :  { %695 = dma.done.wait [#allocation4], 256  }
 0x241   :  { %696 = vsyncadd [#allocation4], 4294967040 }
 0x242   :  { %460 = vsyncpa [#allocation3], 1 }
 0x243   :  { %461 = vsyncpa [#allocation6], 1 }
 0x244   :  { %462 = vsyncpa [#allocation9], 1 }
 0x245   :  { %463 = vsyncpa [#allocation4], 1 }

</bundles_post_ra>
